<compile_context>
chip_gen: v5e
topology: v5e:2x2
jax: 0.10.0
libtpu: 0.0.40
codegen_flags: <defaults>
</compile_context>

<pallas_src>
import numpy as np

import jax
import jax.numpy as jnp
from jax import lax
from jax.experimental import pallas as pl
from jax.experimental.pallas import tpu as pltpu


# ----------------------------------------------------------------------------
# Fused kernel
# ----------------------------------------------------------------------------
def _baseconv_fused_kernel(x_ref, t1_ref, b1_ref, t2_ref, b2_ref, o_ref,
                           s1_ref, s2_ref):
    # x_ref:  (B, H, W*Cin)     bf16  B images, each row flattened as (w, c) on lanes
    # t1_ref: (3, W*Cin, W*C1)  bf16  per-dy row-Toeplitz weights, BN1 scale folded in
    # b1_ref: (1, W*C1)         f32   folded BN1 bias, tiled over W
    # t2_ref: (3, W*C1, W*C2)   bf16
    # b2_ref: (1, W*C2)         f32
    # o_ref:  (B, H, W*C2)      bf16  lane-dense output slab
    # s1_ref: (B*(H+2), W*Cin)  bf16  scratch: images stacked with per-image zero halos
    # s2_ref: (B*(H+2), W*C1)   bf16  scratch: stage-1 activation, same layout
    B, H, _ = x_ref.shape
    S = H + 2                      # per-image slab stride (1-row halo top + bottom)
    M = B * S - 2                  # matmul M: all row centers except the outermost halos

    def conv_stage(s_ref, t_ref, b_ref):
        # 3x3 conv (+ folded BN) + ReLU as 3 MXU matmuls (one per vertical tap),
        # f32 accumulation chain (MRB-friendly on v7x).
        acc = jnp.dot(s_ref[0:M, :], t_ref[0],
                      preferred_element_type=jnp.float32)
        acc = acc + jnp.dot(s_ref[1:M + 1, :], t_ref[1],
                            preferred_element_type=jnp.float32)
        acc = acc + jnp.dot(s_ref[2:M + 2, :], t_ref[2],
                            preferred_element_type=jnp.float32)
        return jnp.maximum(acc + b_ref[...], 0.0)              # bias + ReLU (f32)

    # ---- stage 1: stack images + halos into s1 (already bf16, no extra casts) ----
    z1 = jnp.zeros((1, s1_ref.shape[1]), s1_ref.dtype)
    for b in range(B):
        base = b * S
        s1_ref[base:base + 1, :] = z1
        s1_ref[base + 1:base + 1 + H, :] = x_ref[b, :, :]
        s1_ref[base + 1 + H:base + 2 + H, :] = z1
    a1 = conv_stage(s1_ref, t1_ref, b1_ref)                    # (M, W*C1) f32

    # ---- stage 2: activation stays in VMEM, single f32->bf16 cast ----
    a1 = a1.astype(jnp.bfloat16)
    z2 = jnp.zeros((1, s2_ref.shape[1]), s2_ref.dtype)
    for b in range(B):
        base = b * S
        s2_ref[base:base + 1, :] = z2
        s2_ref[base + 1:base + 1 + H, :] = a1[base:base + H, :]   # valid rows of image b
        s2_ref[base + 1 + H:base + 2 + H, :] = z2
    y = conv_stage(s2_ref, t2_ref, b2_ref)                     # (M, W*C2) f32

    for b in range(B):
        o_ref[b, :, :] = y[b * S:b * S + H, :].astype(o_ref.dtype)


def _baseconv_fused_call(x, t1, b1, t2, b2, b_blk, width):
    N, H, WCin = x.shape
    WC1 = t1.shape[2]
    WC2 = t2.shape[2]
    n_steps = N // b_blk
    cin, c1, c2 = WCin // width, WC1 // width, WC2 // width

    # True conv FLOPs (Toeplitz zero-padded MACs would overstate by ~W/3).
    flops = 2 * 9 * N * H * width * (cin * c1 + c1 * c2)
    bytes_accessed = (x.size * 2 + t1.size * 2 + t2.size * 2
                      + b1.size * 4 + b2.size * 4 + N * H * WC2 * 2)

    # VMEM budget: double-buffered blocks + weights + scratch, with headroom.
    block_bytes = 2 * (b_blk * H * (WCin + WC2) * 2
                       + t1.size * 2 + t2.size * 2 + (b1.size + b2.size) * 4)
    scratch_bytes = b_blk * (H + 2) * (WCin + WC1) * 2
    vmem_limit = int(min(max(2 * (block_bytes + scratch_bytes), 16 << 20), 48 << 20))

    return pl.pallas_call(
        _baseconv_fused_kernel,
        out_shape=jax.ShapeDtypeStruct((N, H, WC2), jnp.bfloat16),
        grid_spec=pltpu.PrefetchScalarGridSpec(
            num_scalar_prefetch=0,
            grid=(n_steps,),
            in_specs=[
                pl.BlockSpec((b_blk, H, WCin), lambda n: (n, 0, 0)),
                pl.BlockSpec((3, t1.shape[1], WC1), lambda n: (0, 0, 0)),
                pl.BlockSpec((1, WC1), lambda n: (0, 0)),
                pl.BlockSpec((3, t2.shape[1], WC2), lambda n: (0, 0, 0)),
                pl.BlockSpec((1, WC2), lambda n: (0, 0)),
            ],
            out_specs=pl.BlockSpec((b_blk, H, WC2), lambda n: (n, 0, 0)),
            scratch_shapes=[
                pltpu.VMEM((b_blk * (H + 2), WCin), jnp.bfloat16),
                pltpu.VMEM((b_blk * (H + 2), WC1), jnp.bfloat16),
            ],
        ),
        compiler_params=pltpu.CompilerParams(
            dimension_semantics=("parallel",),
            vmem_limit_bytes=vmem_limit),
        cost_estimate=pl.CostEstimate(
            flops=int(flops), transcendentals=0,
            bytes_accessed=int(bytes_accessed)),
    )(x, t1, b1, t2, b2)


# ----------------------------------------------------------------------------
# Parameter preparation (one-time, host side)
# ----------------------------------------------------------------------------
def make_baseconv_params(key, in_plane, out_plane, eps=1e-5):
    """Synthetic BaseConv params; eval-mode BatchNorm scale folded into the convs."""
    ks = jax.random.split(key, 10)

    def bn(kg, kb, km, kv, c):
        gamma = jax.random.uniform(kg, (c,), jnp.float32, 0.5, 1.5)
        beta = 0.1 * jax.random.normal(kb, (c,), jnp.float32)
        mean = 0.1 * jax.random.normal(km, (c,), jnp.float32)
        var = jax.random.uniform(kv, (c,), jnp.float32, 0.5, 1.5)
        scale = gamma / jnp.sqrt(var + eps)
        return scale, beta - mean * scale

    # Conv weights in HWIO layout (PyTorch would be OIHW).
    w1 = 0.1 * jax.random.normal(ks[0], (3, 3, in_plane, out_plane), jnp.float32)
    w2 = 0.1 * jax.random.normal(ks[1], (3, 3, out_plane, out_plane), jnp.float32)
    s1, b1 = bn(ks[2], ks[3], ks[4], ks[5], out_plane)
    s2, b2 = bn(ks[6], ks[7], ks[8], ks[9], out_plane)
    # One-time BN fold: w * scale (broadcast over Cout), bias kept separately.
    return dict(w1=w1 * s1, b1=b1, w2=w2 * s2, b2=b2)


def _build_row_toeplitz(w_hwio, width):
    """Expand a (3,3,Cin,Cout) conv weight into per-dy (W*Cin, W*Cout) Toeplitz
    matrices so each vertical tap of the 3x3 conv is one lane-dense matmul."""
    kh, kw, cin, cout = w_hwio.shape
    w = np.asarray(w_hwio, dtype=np.float32)
    t = np.zeros((kh, width * cin, width * cout), np.float32)
    for dy in range(kh):
        for dx in range(kw):
            for ow in range(width):
                iw = ow + dx - 1                 # input column tapped by output col ow
                if 0 <= iw < width:              # out-of-range taps hit the zero border
                    t[dy, iw * cin:(iw + 1) * cin,
                      ow * cout:(ow + 1) * cout] = w[dy, dx]
    return jnp.asarray(t, dtype=jnp.bfloat16)


def prepare_kernel_params(params, width):
    c1 = params["w1"].shape[3]
    c2 = params["w2"].shape[3]
    return dict(
        t1=_build_row_toeplitz(params["w1"], width),
        b1=jnp.tile(params["b1"], width).reshape(1, width * c1).astype(jnp.float32),
        t2=_build_row_toeplitz(params["w2"], width),
        b2=jnp.tile(params["b2"], width).reshape(1, width * c2).astype(jnp.float32),
    )


# ----------------------------------------------------------------------------
# Forward pass (NCHW in / NCHW out, matching the PyTorch module)
# ----------------------------------------------------------------------------
@jax.jit
def baseconv_forward(x_nchw, kparams):
    N, Cin, H, W = x_nchw.shape
    if kparams["t1"].shape[1] != W * Cin:
        raise ValueError("kernel params were prepared for a different W/Cin: "
                         f"got W*Cin={W * Cin}, expected {kparams['t1'].shape[1]}")
    C2 = kparams["t2"].shape[2] // W

    # NCHW f32 -> NHWC -> (N, H, W*Cin) bf16; the reshape is free (row-major),
    # the transpose + cast fuse into one XLA op.
    x = jnp.transpose(x_nchw, (0, 2, 3, 1)).reshape(N, H, W * Cin)
    x = x.astype(jnp.bfloat16)

    # Batch images into the matmul M dimension (target M = b_blk*H ~ 256).
    b_blk = min(N, max(1, 256 // H))
    n_steps = -(-N // b_blk)
    n_pad = n_steps * b_blk
    if n_pad != N:                                     # pad batch to a whole block
        x = jnp.pad(x, ((0, n_pad - N), (0, 0), (0, 0)))

    y = _baseconv_fused_call(x, kparams["t1"], kparams["b1"],
                             kparams["t2"], kparams["b2"], b_blk, W)
    y = y[:N]
    # NHWC bf16 -> NCHW f32 to match the PyTorch interface (NHWC/bf16 consumers
    # should take `y` directly and skip this).
    return jnp.transpose(y.reshape(N, H, W, C2), (0, 3, 1, 2)).astype(jnp.float32)


def _reference_forward(x_nchw, params):
    """Pure-JAX reference mirroring the kernel numerics (bf16 inputs/weights,
    f32 accumulation, folded eval-mode BN)."""
    def q(v):  # bf16 rounding, kept in f32
        return v.astype(jnp.bfloat16).astype(jnp.float32)

    x = jnp.transpose(x_nchw, (0, 2, 3, 1))

    def stage(x, w, b):
        y = lax.conv_general_dilated(
            q(x), q(w), window_strides=(1, 1), padding="SAME",
            dimension_numbers=("NHWC", "HWIO", "NHWC"))
        return jnp.maximum(y + b, 0.0)

    x = stage(x, params["w1"], params["b1"])
    x = stage(x, params["w2"], params["b2"])
    return jnp.transpose(x, (0, 3, 1, 2))


if __name__ == "__main__":
    in_plane, out_plane = 4, 8
    N, H, W = 2, 16, 16

    key = jax.random.PRNGKey(0)
    kx, kp = jax.random.split(key)
    x = jax.random.normal(kx, (N, in_plane, H, W), jnp.float32)  # NCHW like PyTorch
    params = make_baseconv_params(kp, in_plane, out_plane)
    kparams = prepare_kernel_params(params, W)

    out = baseconv_forward(x, kparams)
    out = jax.block_until_ready(out)

    ref = _reference_forward(x, params)
    assert out.shape == (N, out_plane, H, W)
    max_err = float(jnp.max(jnp.abs(out - ref)))
    # Kernel emits bf16, so tolerance covers the final bf16 rounding (~2^-8 rel).
    assert jnp.allclose(out, ref, atol=2e-2, rtol=2e-2), \
        f"mismatch vs reference, max_abs_err={max_err}"

    print("KERNEL_OK")
</pallas_src>

<mosaic_0001>
module attributes {stable_mosaic.version = 11 : i64} {
  func.func @_baseconv_fused_kernel(%arg0: i32, %arg1: memref<2x16x64xbf16, #tpu.memory_space<vmem>>, %arg2: memref<3x64x128xbf16, #tpu.memory_space<vmem>>, %arg3: memref<1x128xf32, #tpu.memory_space<vmem>>, %arg4: memref<3x128x128xbf16, #tpu.memory_space<vmem>>, %arg5: memref<1x128xf32, #tpu.memory_space<vmem>>, %arg6: memref<2x16x128xbf16, #tpu.memory_space<vmem>>, %arg7: memref<36x64xbf16, #tpu.memory_space<vmem>>, %arg8: memref<36x128xbf16, #tpu.memory_space<vmem>>) attributes {dimension_semantics = [#tpu.dimension_semantics<parallel>], iteration_bounds = array<i64: 1>, scalar_prefetch = 0 : i64, scratch_operands = 2 : i64, tpu.core_type = #tpu.core_type<tc>, window_params = [{transform_indices = @transform_0, window_bounds = array<i64: 2, 16, 64>}, {pipeline_mode = #tpu.pipeline_mode<synchronous>, transform_indices = @transform_1, window_bounds = array<i64: 3, 64, 128>}, {pipeline_mode = #tpu.pipeline_mode<synchronous>, transform_indices = @transform_2, window_bounds = array<i64: 1, 128>}, {pipeline_mode = #tpu.pipeline_mode<synchronous>, transform_indices = @transform_3, window_bounds = array<i64: 3, 128, 128>}, {pipeline_mode = #tpu.pipeline_mode<synchronous>, transform_indices = @transform_4, window_bounds = array<i64: 1, 128>}, {transform_indices = @transform_5, window_bounds = array<i64: 2, 16, 128>}]} {
    %cst = arith.constant 0.000000e+00 : bf16
    %0 = vector.broadcast %cst : bf16 to vector<1x64xbf16>
    %c0 = arith.constant 0 : index
    %c0_0 = arith.constant 0 : index
    %1 = vector.load %arg7[%c0, %c0_0] : memref<36x64xbf16, #tpu.memory_space<vmem>>, vector<1x64xbf16>
    tpu.vector_store %arg7[%c0, %c0_0], %0 {strides = array<i32>} : memref<36x64xbf16, #tpu.memory_space<vmem>>, vector<1x64xbf16>,
    %c0_1 = arith.constant 0 : index
    %c0_2 = arith.constant 0 : index
    %c0_3 = arith.constant 0 : index
    %2 = vector.load %arg1[%c0_1, %c0_2, %c0_3] : memref<2x16x64xbf16, #tpu.memory_space<vmem>>, vector<1x16x64xbf16>
    %3 = vector.shape_cast %2 : vector<1x16x64xbf16> to vector<16x64xbf16>
    %c1 = arith.constant 1 : index
    %c0_4 = arith.constant 0 : index
    %4 = vector.load %arg7[%c1, %c0_4] : memref<36x64xbf16, #tpu.memory_space<vmem>>, vector<16x64xbf16>
    tpu.vector_store %arg7[%c1, %c0_4], %3 {strides = array<i32>} : memref<36x64xbf16, #tpu.memory_space<vmem>>, vector<16x64xbf16>,
    %c17 = arith.constant 17 : index
    %c0_5 = arith.constant 0 : index
    %5 = vector.load %arg7[%c17, %c0_5] : memref<36x64xbf16, #tpu.memory_space<vmem>>, vector<1x64xbf16>
    tpu.vector_store %arg7[%c17, %c0_5], %0 {strides = array<i32>} : memref<36x64xbf16, #tpu.memory_space<vmem>>, vector<1x64xbf16>,
    %c18 = arith.constant 18 : index
    %c0_6 = arith.constant 0 : index
    %6 = vector.load %arg7[%c18, %c0_6] : memref<36x64xbf16, #tpu.memory_space<vmem>>, vector<1x64xbf16>
    tpu.vector_store %arg7[%c18, %c0_6], %0 {strides = array<i32>} : memref<36x64xbf16, #tpu.memory_space<vmem>>, vector<1x64xbf16>,
    %c1_7 = arith.constant 1 : index
    %c0_8 = arith.constant 0 : index
    %c0_9 = arith.constant 0 : index
    %7 = vector.load %arg1[%c1_7, %c0_8, %c0_9] : memref<2x16x64xbf16, #tpu.memory_space<vmem>>, vector<1x16x64xbf16>
    %8 = vector.shape_cast %7 : vector<1x16x64xbf16> to vector<16x64xbf16>
    %c19 = arith.constant 19 : index
    %c0_10 = arith.constant 0 : index
    %9 = vector.load %arg7[%c19, %c0_10] : memref<36x64xbf16, #tpu.memory_space<vmem>>, vector<16x64xbf16>
    tpu.vector_store %arg7[%c19, %c0_10], %8 {strides = array<i32>} : memref<36x64xbf16, #tpu.memory_space<vmem>>, vector<16x64xbf16>,
    %c35 = arith.constant 35 : index
    %c0_11 = arith.constant 0 : index
    %10 = vector.load %arg7[%c35, %c0_11] : memref<36x64xbf16, #tpu.memory_space<vmem>>, vector<1x64xbf16>
    tpu.vector_store %arg7[%c35, %c0_11], %0 {strides = array<i32>} : memref<36x64xbf16, #tpu.memory_space<vmem>>, vector<1x64xbf16>,
    %c0_12 = arith.constant 0 : index
    %c0_13 = arith.constant 0 : index
    %11 = vector.load %arg7[%c0_12, %c0_13] : memref<36x64xbf16, #tpu.memory_space<vmem>>, vector<34x64xbf16>
    %c0_14 = arith.constant 0 : index
    %c0_15 = arith.constant 0 : index
    %c0_16 = arith.constant 0 : index
    %12 = vector.load %arg2[%c0_14, %c0_15, %c0_16] : memref<3x64x128xbf16, #tpu.memory_space<vmem>>, vector<1x64x128xbf16>
    %13 = vector.shape_cast %12 : vector<1x64x128xbf16> to vector<64x128xbf16>
    %cst_17 = arith.constant dense<0.000000e+00> : vector<34x128xf32>
    %14 = tpu.matmul %11, %13, %cst_17 {dimension_numbers = #tpu.dot_dimension_numbers<[1], [0], [0], [1], [0, 0, 1, 1], [], []>} : vector<34x64xbf16>, vector<64x128xbf16>, vector<34x128xf32> -> vector<34x128xf32>
    %c1_18 = arith.constant 1 : index
    %c0_19 = arith.constant 0 : index
    %15 = vector.load %arg7[%c1_18, %c0_19] : memref<36x64xbf16, #tpu.memory_space<vmem>>, vector<34x64xbf16>
    %c1_20 = arith.constant 1 : index
    %c0_21 = arith.constant 0 : index
    %c0_22 = arith.constant 0 : index
    %16 = vector.load %arg2[%c1_20, %c0_21, %c0_22] : memref<3x64x128xbf16, #tpu.memory_space<vmem>>, vector<1x64x128xbf16>
    %17 = vector.shape_cast %16 : vector<1x64x128xbf16> to vector<64x128xbf16>
    %cst_23 = arith.constant dense<0.000000e+00> : vector<34x128xf32>
    %18 = tpu.matmul %15, %17, %cst_23 {dimension_numbers = #tpu.dot_dimension_numbers<[1], [0], [0], [1], [0, 0, 1, 1], [], []>} : vector<34x64xbf16>, vector<64x128xbf16>, vector<34x128xf32> -> vector<34x128xf32>
    %19 = arith.addf %14, %18 : vector<34x128xf32>
    %c2 = arith.constant 2 : index
    %c0_24 = arith.constant 0 : index
    %20 = vector.load %arg7[%c2, %c0_24] : memref<36x64xbf16, #tpu.memory_space<vmem>>, vector<34x64xbf16>
    %c2_25 = arith.constant 2 : index
    %c0_26 = arith.constant 0 : index
    %c0_27 = arith.constant 0 : index
    %21 = vector.load %arg2[%c2_25, %c0_26, %c0_27] : memref<3x64x128xbf16, #tpu.memory_space<vmem>>, vector<1x64x128xbf16>
    %22 = vector.shape_cast %21 : vector<1x64x128xbf16> to vector<64x128xbf16>
    %cst_28 = arith.constant dense<0.000000e+00> : vector<34x128xf32>
    %23 = tpu.matmul %20, %22, %cst_28 {dimension_numbers = #tpu.dot_dimension_numbers<[1], [0], [0], [1], [0, 0, 1, 1], [], []>} : vector<34x64xbf16>, vector<64x128xbf16>, vector<34x128xf32> -> vector<34x128xf32>
    %24 = arith.addf %19, %23 : vector<34x128xf32>
    %c0_29 = arith.constant 0 : index
    %c0_30 = arith.constant 0 : index
    %25 = vector.load %arg3[%c0_29, %c0_30] : memref<1x128xf32, #tpu.memory_space<vmem>>, vector<1x128xf32>
    %26 = vector.broadcast %25 : vector<1x128xf32> to vector<34x128xf32>
    %27 = arith.addf %24, %26 : vector<34x128xf32>
    %cst_31 = arith.constant 0.000000e+00 : f32
    %28 = vector.broadcast %cst_31 : f32 to vector<34x128xf32>
    %29 = arith.maximumf %27, %28 : vector<34x128xf32>
    %30 = arith.truncf %29 : vector<34x128xf32> to vector<34x128xbf16>
    %cst_32 = arith.constant 0.000000e+00 : bf16
    %31 = vector.broadcast %cst_32 : bf16 to vector<1x128xbf16>
    %c0_33 = arith.constant 0 : index
    %c0_34 = arith.constant 0 : index
    %32 = vector.load %arg8[%c0_33, %c0_34] : memref<36x128xbf16, #tpu.memory_space<vmem>>, vector<1x128xbf16>
    tpu.vector_store %arg8[%c0_33, %c0_34], %31 {strides = array<i32>} : memref<36x128xbf16, #tpu.memory_space<vmem>>, vector<1x128xbf16>,
    %33 = vector.extract_strided_slice %30 {offsets = [0, 0], sizes = [16, 128], strides = [1, 1]} : vector<34x128xbf16> to vector<16x128xbf16>
    %c1_35 = arith.constant 1 : index
    %c0_36 = arith.constant 0 : index
    %34 = vector.load %arg8[%c1_35, %c0_36] : memref<36x128xbf16, #tpu.memory_space<vmem>>, vector<16x128xbf16>
    tpu.vector_store %arg8[%c1_35, %c0_36], %33 {strides = array<i32>} : memref<36x128xbf16, #tpu.memory_space<vmem>>, vector<16x128xbf16>,
    %c17_37 = arith.constant 17 : index
    %c0_38 = arith.constant 0 : index
    %35 = vector.load %arg8[%c17_37, %c0_38] : memref<36x128xbf16, #tpu.memory_space<vmem>>, vector<1x128xbf16>
    tpu.vector_store %arg8[%c17_37, %c0_38], %31 {strides = array<i32>} : memref<36x128xbf16, #tpu.memory_space<vmem>>, vector<1x128xbf16>,
    %c18_39 = arith.constant 18 : index
    %c0_40 = arith.constant 0 : index
    %36 = vector.load %arg8[%c18_39, %c0_40] : memref<36x128xbf16, #tpu.memory_space<vmem>>, vector<1x128xbf16>
    tpu.vector_store %arg8[%c18_39, %c0_40], %31 {strides = array<i32>} : memref<36x128xbf16, #tpu.memory_space<vmem>>, vector<1x128xbf16>,
    %37 = vector.extract_strided_slice %30 {offsets = [18, 0], sizes = [16, 128], strides = [1, 1]} : vector<34x128xbf16> to vector<16x128xbf16>
    %c19_41 = arith.constant 19 : index
    %c0_42 = arith.constant 0 : index
    %38 = vector.load %arg8[%c19_41, %c0_42] : memref<36x128xbf16, #tpu.memory_space<vmem>>, vector<16x128xbf16>
    tpu.vector_store %arg8[%c19_41, %c0_42], %37 {strides = array<i32>} : memref<36x128xbf16, #tpu.memory_space<vmem>>, vector<16x128xbf16>,
    %c35_43 = arith.constant 35 : index
    %c0_44 = arith.constant 0 : index
    %39 = vector.load %arg8[%c35_43, %c0_44] : memref<36x128xbf16, #tpu.memory_space<vmem>>, vector<1x128xbf16>
    tpu.vector_store %arg8[%c35_43, %c0_44], %31 {strides = array<i32>} : memref<36x128xbf16, #tpu.memory_space<vmem>>, vector<1x128xbf16>,
    %c0_45 = arith.constant 0 : index
    %c0_46 = arith.constant 0 : index
    %40 = vector.load %arg8[%c0_45, %c0_46] : memref<36x128xbf16, #tpu.memory_space<vmem>>, vector<34x128xbf16>
    %c0_47 = arith.constant 0 : index
    %c0_48 = arith.constant 0 : index
    %c0_49 = arith.constant 0 : index
    %41 = vector.load %arg4[%c0_47, %c0_48, %c0_49] : memref<3x128x128xbf16, #tpu.memory_space<vmem>>, vector<1x128x128xbf16>
    %42 = vector.shape_cast %41 : vector<1x128x128xbf16> to vector<128x128xbf16>
    %cst_50 = arith.constant dense<0.000000e+00> : vector<34x128xf32>
    %43 = tpu.matmul %40, %42, %cst_50 {dimension_numbers = #tpu.dot_dimension_numbers<[1], [0], [0], [1], [0, 0, 1, 1], [], []>} : vector<34x128xbf16>, vector<128x128xbf16>, vector<34x128xf32> -> vector<34x128xf32>
    %c1_51 = arith.constant 1 : index
    %c0_52 = arith.constant 0 : index
    %44 = vector.load %arg8[%c1_51, %c0_52] : memref<36x128xbf16, #tpu.memory_space<vmem>>, vector<34x128xbf16>
    %c1_53 = arith.constant 1 : index
    %c0_54 = arith.constant 0 : index
    %c0_55 = arith.constant 0 : index
    %45 = vector.load %arg4[%c1_53, %c0_54, %c0_55] : memref<3x128x128xbf16, #tpu.memory_space<vmem>>, vector<1x128x128xbf16>
    %46 = vector.shape_cast %45 : vector<1x128x128xbf16> to vector<128x128xbf16>
    %cst_56 = arith.constant dense<0.000000e+00> : vector<34x128xf32>
    %47 = tpu.matmul %44, %46, %cst_56 {dimension_numbers = #tpu.dot_dimension_numbers<[1], [0], [0], [1], [0, 0, 1, 1], [], []>} : vector<34x128xbf16>, vector<128x128xbf16>, vector<34x128xf32> -> vector<34x128xf32>
    %48 = arith.addf %43, %47 : vector<34x128xf32>
    %c2_57 = arith.constant 2 : index
    %c0_58 = arith.constant 0 : index
    %49 = vector.load %arg8[%c2_57, %c0_58] : memref<36x128xbf16, #tpu.memory_space<vmem>>, vector<34x128xbf16>
    %c2_59 = arith.constant 2 : index
    %c0_60 = arith.constant 0 : index
    %c0_61 = arith.constant 0 : index
    %50 = vector.load %arg4[%c2_59, %c0_60, %c0_61] : memref<3x128x128xbf16, #tpu.memory_space<vmem>>, vector<1x128x128xbf16>
    %51 = vector.shape_cast %50 : vector<1x128x128xbf16> to vector<128x128xbf16>
    %cst_62 = arith.constant dense<0.000000e+00> : vector<34x128xf32>
    %52 = tpu.matmul %49, %51, %cst_62 {dimension_numbers = #tpu.dot_dimension_numbers<[1], [0], [0], [1], [0, 0, 1, 1], [], []>} : vector<34x128xbf16>, vector<128x128xbf16>, vector<34x128xf32> -> vector<34x128xf32>
    %53 = arith.addf %48, %52 : vector<34x128xf32>
    %c0_63 = arith.constant 0 : index
    %c0_64 = arith.constant 0 : index
    %54 = vector.load %arg5[%c0_63, %c0_64] : memref<1x128xf32, #tpu.memory_space<vmem>>, vector<1x128xf32>
    %55 = vector.broadcast %54 : vector<1x128xf32> to vector<34x128xf32>
    %56 = arith.addf %53, %55 : vector<34x128xf32>
    %cst_65 = arith.constant 0.000000e+00 : f32
    %57 = vector.broadcast %cst_65 : f32 to vector<34x128xf32>
    %58 = arith.maximumf %56, %57 : vector<34x128xf32>
    %59 = vector.extract_strided_slice %58 {offsets = [0, 0], sizes = [16, 128], strides = [1, 1]} : vector<34x128xf32> to vector<16x128xf32>
    %60 = arith.truncf %59 : vector<16x128xf32> to vector<16x128xbf16>
    %c0_66 = arith.constant 0 : index
    %c0_67 = arith.constant 0 : index
    %c0_68 = arith.constant 0 : index
    %61 = vector.load %arg6[%c0_66, %c0_67, %c0_68] : memref<2x16x128xbf16, #tpu.memory_space<vmem>>, vector<1x16x128xbf16>
    %62 = vector.shape_cast %61 : vector<1x16x128xbf16> to vector<16x128xbf16>
    %63 = vector.shape_cast %60 : vector<16x128xbf16> to vector<1x16x128xbf16>
    tpu.vector_store %arg6[%c0_66, %c0_67, %c0_68], %63 {strides = array<i32>} : memref<2x16x128xbf16, #tpu.memory_space<vmem>>, vector<1x16x128xbf16>,
    %64 = vector.extract_strided_slice %58 {offsets = [18, 0], sizes = [16, 128], strides = [1, 1]} : vector<34x128xf32> to vector<16x128xf32>
    %65 = arith.truncf %64 : vector<16x128xf32> to vector<16x128xbf16>
    %c1_69 = arith.constant 1 : index
    %c0_70 = arith.constant 0 : index
    %c0_71 = arith.constant 0 : index
    %66 = vector.load %arg6[%c1_69, %c0_70, %c0_71] : memref<2x16x128xbf16, #tpu.memory_space<vmem>>, vector<1x16x128xbf16>
    %67 = vector.shape_cast %66 : vector<1x16x128xbf16> to vector<16x128xbf16>
    %68 = vector.shape_cast %65 : vector<16x128xbf16> to vector<1x16x128xbf16>
    tpu.vector_store %arg6[%c1_69, %c0_70, %c0_71], %68 {strides = array<i32>} : memref<2x16x128xbf16, #tpu.memory_space<vmem>>, vector<1x16x128xbf16>,
    return
  }
  func.func @transform_0(%arg0: i32) -> (i32, i32, i32) {
    %c0_i32 = arith.constant 0 : i32
    %c0_i32_0 = arith.constant 0 : i32
    %c0_i32_1 = arith.constant 0 : i32
    return %arg0, %c0_i32, %c0_i32_0 : i32, i32, i32
  }
  func.func @transform_1(%arg0: i32) -> (i32, i32, i32) {
    %c0_i32 = arith.constant 0 : i32
    %c0_i32_0 = arith.constant 0 : i32
    %c0_i32_1 = arith.constant 0 : i32
    %c0_i32_2 = arith.constant 0 : i32
    return %c0_i32, %c0_i32_0, %c0_i32_1 : i32, i32, i32
  }
  func.func @transform_2(%arg0: i32) -> (i32, i32) {
    %c0_i32 = arith.constant 0 : i32
    %c0_i32_0 = arith.constant 0 : i32
    %c0_i32_1 = arith.constant 0 : i32
    return %c0_i32, %c0_i32_0 : i32, i32
  }
  func.func @transform_3(%arg0: i32) -> (i32, i32, i32) {
    %c0_i32 = arith.constant 0 : i32
    %c0_i32_0 = arith.constant 0 : i32
    %c0_i32_1 = arith.constant 0 : i32
    %c0_i32_2 = arith.constant 0 : i32
    return %c0_i32, %c0_i32_0, %c0_i32_1 : i32, i32, i32
  }
  func.func @transform_4(%arg0: i32) -> (i32, i32) {
    %c0_i32 = arith.constant 0 : i32
    %c0_i32_0 = arith.constant 0 : i32
    %c0_i32_1 = arith.constant 0 : i32
    return %c0_i32, %c0_i32_0 : i32, i32
  }
  func.func @transform_5(%arg0: i32) -> (i32, i32, i32) {
    %c0_i32 = arith.constant 0 : i32
    %c0_i32_0 = arith.constant 0 : i32
    %c0_i32_1 = arith.constant 0 : i32
    return %arg0, %c0_i32, %c0_i32_0 : i32, i32, i32
  }
}

</mosaic_0001>

<bundles_post_ra>
// kernel: baseconv_forward.1
= control target key start
LH: loop header
LB: loop body
LE: loop exit
PB: predicated region body
PF: predicated region fallthrough
CT: control target
= control target key end

     0   :  { %v69_v0 = vld [vmem:[#allocation2 + $0x8] sm:$0x2]  ;;  %vm66_vm0 = vcmask 517121   ;;  %vm67_vm1 = vsmask.f32 1280  ;;  %vm106_vm3 = vcmask 517120   ;;  %s1375_s1 = inlined_call_operand.vmem [shape: bf16[3,64,128], index: 1, kind: input, shape index: {}]   ;;  %s1376_s0 = inlined_call_operand.vmem [shape: bf16[2,16,64], index: 0, kind: input, shape index: {}]   ;;  %s1377_s2 = inlined_call_operand.vmem [shape: f32[1,128], index: 2, kind: input, shape index: {}]   ;;  %s1378_s3 = inlined_call_operand.vmem [shape: bf16[3,128,128], index: 3, kind: input, shape index: {}]   ;;  %s1379_s4 = inlined_call_operand.vmem [shape: f32[1,128], index: 4, kind: input, shape index: {}]   ;;  %s1380_s5 = inlined_call_operand.vmem [shape: bf16[2,16,128], index: 5, kind: output, shape index: {}]  }
   0x1   :  { %v1070_v1 = vld [vmem:[%s1375_s1 + $0x38] sm:$0xff]  ;;  %vm68_vm2 = vmand %vm66_vm0, %vm67_vm1  ;;  %v849_v2 = vld [vmem:[%s1376_s0 + $0xc] sm:$0xf]  ;;  %vm21_vm5 = vcmask 516096   ;;  %vm22_vm6 = vsmask.f32 256 }
   0x2   :  { %1119 = vmatpush.bf16.msra.mxu2 %v1070_v1  ;;  %v1069_v3 = vld [vmem:[%s1375_s1 + $0x30] sm:$0xff]  ;;  %v70_v4 = vsel %vm68_vm2, 0, %v69_v0  ;;  %v87_v5 = vshrl.u32 %v849_v2, 16  ;;  %v90_v6 = vshll.u32 %v849_v2, 16  ;;  %213 = vmatpush.bf16.msra.mxu0 %v1070_v1  ;;  %v1066_v9 = vld [vmem:[%s1375_s1 + $0x18] sm:$0xff]  ;;  %v1068_v10 = vld [vmem:[%s1375_s1 + $0x28] sm:$0xff] }
   0x3   :  { %71 = vst [vmem:[#allocation2 + $0x8] sm:$0x2] %v70_v4  ;;  %vm107_vm4 = vmand %vm106_vm3, %vm67_vm1  ;;  %v108_v12 = vld [vmem:[#allocation2 + $0x10] sm:$0x3]  ;;  %270 = vmatpush.bf16.msra.mxu1 %v1066_v9  ;;  %v28_v14 = vld [vmem:[%s1376_s0 + $0x4] sm:$0xf] }
   0x4   :  { %v89_v7 = vrot.slane %v87_v5, 6  ;;  %v92_v8 = vrot.slane %v90_v6, 7  ;;  %v1065_v15 = vld [vmem:[%s1375_s1 + $0x10] sm:$0xff]  ;;  %v40_v16 = vshrl.u32 %v28_v14, 16  ;;  %v1067_v17 = vld [vmem:[%s1375_s1 + $0x20] sm:$0xff]  ;;  %v1064_v20 = vld [vmem:[%s1375_s1 + $0x8] sm:$0xff] }
   0x5   :  { %vm100_vm7 = vsmask.f32 7942  ;;  %vm23_vm8 = vmand %vm21_vm5, %vm22_vm6  ;;  %v24_v21 = vld [vmem:[#allocation2] sm:$0x1]  ;;  %v59_v24 = vld [vmem:[#allocation2 + $0x8] sm:$0x1] }
   0x6   :  { %1120 = vmatpush.bf16.msra.mxu2 %v1069_v3  ;;  %v1176_v11 = vor.u32 %v92_v8, %v89_v7  ;;  %214 = vmatpush.bf16.msra.mxu0 %v1069_v3  ;;  %v42_v19 = vrot.slane %v40_v16, 7  ;;  %v25_v23 = vsel %vm23_vm8, 0, %v24_v21  ;;  %v848_v26 = vld [vmem:[%s1376_s0 + $0x8] sm:$0xf]  ;;  %vm111_vm9 = vmand %vm66_vm0, %vm100_vm7  ;;  %v27_v27 = vld [vmem:[%s1376_s0] sm:$0xf] }
   0x7   :  { %271 = vmatpush.bf16.msra.mxu1 %v1065_v15  ;;  %26 = vst [vmem:[#allocation2] sm:$0x1] %v25_v23  ;;  %v78_v28 = vshrl.u32 %v848_v26, 16  ;;  %v81_v29 = vshll.u32 %v848_v26, 16  ;;  %v1063_v30 = vld [vmem:[%s1375_s1] sm:$0xff]  ;;  %v32_v31 = vshrl.u32 %v27_v27, 16 }
   0x8   :  { %v95_v13 = vrot.slane %v1176_v11, 4  ;;  %v47_v22 = vrot.slane %v42_v19, 4  ;;  %v35_v37 = vshll.u32 %v27_v27, 16  ;;  %v43_v38 = vshll.u32 %v28_v14, 16  ;;  %v1074_v62 = vld [vmem:[%s1375_s1 + $0x58] sm:$0xff]  ;;  %v1073_v4 = vld [vmem:[%s1375_s1 + $0x50] sm:$0xff] }
   0x9   :  { %v80_v33 = vrot.slane %v78_v28, 6  ;;  %v83_v34 = vrot.slane %v81_v29, 7  ;;  %v34_v36 = vrot.slane %v32_v31, 7  ;;  %vm29_vm10 = vsmask.f32 4368  ;;  %v1072_v8 = vld [vmem:[%s1375_s1 + $0x48] sm:$0xff] }
   0xa   :  { %1121 = vmatpush.bf16.msra.mxu2 %v1068_v10  ;;  %v109_v18 = vsel %vm107_vm4, %v95_v13, %v108_v12  ;;  %215 = vmatpush.bf16.msra.mxu0 %v1068_v10  ;;  %v60_v25 = vsel %vm23_vm8, %v47_v22, %v59_v24  ;;  %v45_v42 = vor.u32 %v43_v38, %v42_v19  ;;  %vm51_vm11 = vcmask 519168   ;;  %vm1206_vm13 = vmor %vm22_vm6, %vm29_vm10  ;;  %v102_v49 = vld [vmem:[#allocation2 + $0x8] sm:$0xe]  ;;  %v1071_v10 = vld [vmem:[%s1375_s1 + $0x40] sm:$0xff] }
   0xb   :  { %110 = vst [vmem:[#allocation2 + $0x10] sm:$0x3] %v109_v18  ;;  %272 = vmatpush.bf16.msra.mxu1 %v1064_v20  ;;  %v84_v39 = vor.u32 %v83_v34, %v80_v33  ;;  %v37_v40 = vor.u32 %v35_v37, %v34_v36  ;;  %v38_v41 = vrot.slane %v34_v36, 4  ;;  %vm52_vm12 = vsmask.f32 7938  ;;  %v1083_v23 = vld [vmem:[%s1378_s3 + $0x38] sm:$0xff] }
   0xc   :  { %61 = vst [vmem:[#allocation2 + $0x8] sm:$0x1] %v60_v25  ;;  %vm75_vm14 = vsmask.f32 5392  ;;  %vm53_vm15 = vmand %vm51_vm11, %vm52_vm12  ;;  %vm99_vm0 = vcmask 519169   ;;  %v1082_v25 = vld [vmem:[%s1378_s3 + $0x30] sm:$0xff] }
   0xd   :  { %v46_v46 = vsel %vm1206_vm13, %v38_v41, %v45_v42  ;;  %v85_v47 = vrot.slane %v84_v39, 4  ;;  %vm62_vm2 = vmand %vm21_vm5, %vm52_vm12  ;;  %vm199_vm5 = vcmask 523264   ;;  %vm151_vm8 = vsmask.f32 7424  ;;  %v390_v27 = vld [vmem:[#allocation3] sm:$0x1] }
   0xe   :  { %1122 = vmatpush.bf16.msra.mxu2 %v1067_v17  ;;  %216 = vmatpush.bf16.msra.mxu0 %v1067_v17  ;;  %v54_v44 = vld [vmem:[#allocation2] sm:$0xf]  ;;  %58 = vst.msk [vmem:[#allocation2 + $0x4] sm:$0xf] %vm51_vm11, %v46_v46  ;;  %vm76_vm3 = vmor %vm67_vm1, %vm75_vm14  ;;  %vm388_vm10 = vcmask 1040384   ;;  %v1079_v33 = vld [vmem:[%s1378_s3 + $0x18] sm:$0xff] }
   0xf   :  { %273 = vmatpush.bf16.msra.mxu1 %v1063_v30  ;;  %v55_v48 = vsel %vm53_vm15, %v37_v40, %v54_v44  ;;  %v94_v52 = vsel %vm76_vm3, %v85_v47, %v1176_v11  ;;  %vm101_vm4 = vmand %vm99_vm0, %vm100_vm7  ;;  %v1080_v31 = vld [vmem:[%s1378_s3 + $0x20] sm:$0xff]  ;;  %v1078_v34 = vld [vmem:[%s1378_s3 + $0x10] sm:$0xff]  ;;  %vm413_vm15 = vcmask 1043456  }
  0x10   :  { %56 = vst [vmem:[#allocation2] sm:$0xf] %v55_v48  ;;  %v103_v54 = vsel %vm101_vm4, %v84_v39, %v102_v49  ;;  %v428_v38 = vld [vmem:[#allocation3 + $0x8] sm:$0x2]  ;;  %v1077_v42 = vld [vmem:[%s1378_s3 + $0x8] sm:$0xff]  ;;  %v1098_v44 = vld [vmem:[%s1378_s3 + $0xb0] sm:$0xff] }
  0x11   :  { %105 = vst.msk [vmem:[#allocation2 + $0xc] sm:$0xf] %vm51_vm11, %v94_v52  ;;  %vm1256_vm11 = vmand %vm388_vm10, %vm22_vm6  ;;  %vm426_vm6 = vcmask 1041409   ;;  %v1091_v40 = vld [vmem:[%s1378_s3 + $0x78] sm:$0xff]  ;;  %v1076_v46 = vld [vmem:[%s1378_s3] sm:$0xff] }
  0x12   :  { %1123 = vmatpush.bf16.msrb.mxu2 %v1066_v9  ;;  %v112_v32 = vld [vmem:[#allocation2 + $0x10] sm:$0x2]  ;;  %104 = vst [vmem:[#allocation2 + $0x8] sm:$0xe] %v103_v54  ;;  %v119_v7 = vld [vmem:[#allocation2 + $0x10] sm:$0x1]  ;;  %677 = vmatpush.bf16.msrb.mxu0 %v1083_v23  ;;  %vm427_vm14 = vmand %vm426_vm6, %vm67_vm1 }
  0x13   :  { %v113_v35 = vsel %vm111_vm9, 0, %v112_v32  ;;  %v63_v45 = vld [vmem:[#allocation2 + $0x8] sm:$0x1]  ;;  %v233_v9 = vunpack.c.l.b16 %v119_v7  ;;  %vm302_vm9 = vcmask 1046528   ;;  %v391_v28 = vsel %vm1256_vm11, 0, %v390_v27  ;;  %600 = vmatpush.bf16.msra.mxu3 %v1091_v40  ;;  %v1096_v54 = vld [vmem:[%s1378_s3 + $0xa0] sm:$0xff]  ;;  %vm414_vm0 = vmand %vm413_vm15, %vm52_vm12 }
  0x14   :  { %114 = vst [vmem:[#allocation2 + $0x10] sm:$0x2] %v113_v35  ;;  %v64_v50 = vsel %vm62_vm2, 0, %v63_v45  ;;  %v1099_v35 = vld [vmem:[%s1378_s3 + $0xb8] sm:$0xff]  ;;  %v429_v39 = vsel %vm427_vm14, 0, %v428_v38  ;;  %v1090_v45 = vld [vmem:[%s1378_s3 + $0x70] sm:$0xff]  ;;  %vm422_vm4 = vmand %vm388_vm10, %vm52_vm12 }
  0x15   :  { %65 = vst [vmem:[#allocation2 + $0x8] sm:$0x1] %v64_v50  ;;  %v234_v12 = vpack.c.b16 %v233_v9, %v233_v9  ;;  %v1113_v14 = vld [vmem:[#allocation2] sm:$0xf0]  ;;  %777 = vmatpush.bf16.msrb.mxu1 %v1099_v35  ;;  %v1097_v47 = vld [vmem:[%s1378_s3 + $0xa8] sm:$0xff]  ;;  %vm459_vm2 = vcmask 1043457  }
  0x16   :  { %1124 = vmatpush.bf16.msrb.mxu2 %v1065_v15  ;;  %678 = vmatpush.bf16.msrb.mxu0 %v1082_v25  ;;  %392 = vst [vmem:[#allocation3] sm:$0x1] %v391_v28  ;;  %v1089_v49 = vld [vmem:[%s1378_s3 + $0x68] sm:$0xff]  ;;  %v1305_v50 = vld [vmem:[%s1377_s2] ss:$0 sm:$0xff]  ;;  %vm460_vm3 = vmand %vm459_vm2, %vm100_vm7  ;;  %vm465_vm12 = vcmask 1041408  }
  0x17   :  { %v1101_v58 = vld [vmem:[#allocation2] sm:$0xff]   ;;  %430 = vst [vmem:[#allocation3 + $0x8] sm:$0x2] %v429_v39  ;;  %601 = vmatpush.bf16.msra.mxu3 %v1090_v45  ;;  %v419_v27 = vld [vmem:[#allocation3 + $0x8] sm:$0x1] }
  0x18   :  { %v153_v60 = vshrl.u32 %v1101_v58, 16  ;;  %v155_v61 = vshll.u32 %v1101_v58, 16  ;;  %897 = vmatmul.msk.bf16.vlgmr.msra.gmra.mxu1 %vm199_vm5, %v1101_v58  ;;  %v1114_v15 = vld [vmem:[#allocation2] sm:$0xe]  ;;  %v1095_v58 = vld [vmem:[%s1378_s3 + $0x98] sm:$0xff] }
  0x19   :  { %v1115_v17 = vor.u32 %v1114_v15, %v1113_v14  ;;  %778 = vmatpush.bf16.msrb.mxu1 %v1098_v44  ;;  %v1085_v14 = vld [vmem:[%s1378_s3 + $0x48] sm:$0xff] }
  0x1a   :  { %1125 = vmatpush.bf16.msrb.mxu2 %v1064_v20  ;;  %v157_v1 = vrot.slane %v155_v61, 1 }
  0x1b   :  { %v128_v51 = vld [vmem:[#allocation2 + $0x10] sm:$0x3]  ;;  %v303_v18 = vrot.slane %v1115_v17, 1  ;;  %602 = vmatpush.bf16.msra.mxu3 %v1089_v49 }
  0x1c   :  { %v147_v53 = vunpack.c.l.b16 %v128_v51  ;;  %v1062_v0 = vld [vmem:[#allocation2 + $0x8] sm:$0xff]  ;;  %v158_v2 = vor.u32 %v157_v1, %v153_v60  ;;  %v1087_v60 = vld [vmem:[%s1378_s3 + $0x58] sm:$0xff] }
  0x1d   :  { %v160_v3 = vshll.u32 %v1062_v0, 16  ;;  %v164_v11 = vshrl.u32 %v1062_v0, 16  ;;  %v304_v19 = vrot.slane %v1062_v0, 1  ;;  %779 = vmatpush.bf16.msrb.mxu1 %v1097_v47  ;;  %v415_v9 = vld [vmem:[#allocation3] sm:$0xf] }
  0x1e   :  { %1126 = vmatpush.bf16.msrb.mxu2 %v1063_v30  ;;  %v150_v55 = vpack.c.b16 %v147_v53, %v147_v53  ;;  %v1081_v30 = vld [vmem:[%s1378_s3 + $0x28] sm:$0xff] }
  0x1f   :  { %v162_v5 = vrot.slane %v160_v3, 1  ;;  %v305_v20 = vsel %vm302_vm9, %v303_v18, %v304_v19  ;;  %679 = vmatpush.bf16.msrb.mxu0 %v1081_v30  ;;  %v1092_v18 = vld [vmem:[%s1378_s3 + $0x80] sm:$0xff] }
  0x20   :  { %v168_v56 = vshll.u32 %v150_v55, 16  ;;  %v172_v57 = vshrl.u32 %v150_v55, 16  ;;  %v306_v21 = vrot.slane %v150_v55, 1 }
  0x21   :  { %v163_v6 = vsel %vm151_vm8, %v158_v2, %v162_v5  ;;  %v166_v13 = vor.u32 %v164_v11, %v162_v5  ;;  %780 = vmatpush.bf16.msrb.mxu1 %v1096_v54  ;;  %v1086_v5 = vld [vmem:[%s1378_s3 + $0x50] sm:$0xff] }
  0x22   :  { %v170_v59 = vrot.slane %v168_v56, 1  ;;  %878 = vmatmul.msk.bf16.vlgmr.msra.gmra.mxu0 %vm199_vm5, %v163_v6  ;;  %v307_v22 = vsel %vm302_vm9, %v304_v19, %v306_v21  ;;  %v1088_v56 = vld [vmem:[%s1378_s3 + $0x60] sm:$0xff] }
  0x23   :  { %680 = vmatpush.bf16.msrb.mxu0 %v1080_v31  ;;  %603 = vmatpush.bf16.msra.mxu3 %v1088_v56 }
  0x24   :  { %v174_v63 = vor.u32 %v172_v57, %v170_v59  ;;  %v171_v16 = vsel %vm151_vm8, %v166_v13, %v170_v59 }
  0x25   :  { %781 = vmatpush.bf16.msrb.mxu1 %v1095_v58 }
  0x26   :  { %880 = vmatmul.msk.bf16.vlgmr.msra.gmra.mxu2 %vm199_vm5, %v174_v63 }
  0x27   :  { %345 = vmatpush.bf16.msra.mxu2 %v1074_v62  ;;  %681 = vmatpush.bf16.msrb.mxu0 %v1079_v33 }
  0x28   :  { %898 = vmatmul.msk.bf16.gmra.mxu1 %vm199_vm5, %v1062_v0  ;;  %v1094_v0 = vld [vmem:[%s1378_s3 + $0x90] sm:$0xff]  ;;  %604 = vmatpush.bf16.msra.mxu3 %v1087_v60 }
  0x29   :  { %782 = vmatpush.bf16.msrb.mxu1 %v1094_v0 }
  0x2b   :  { %346 = vmatpush.bf16.msra.mxu2 %v1073_v4  ;;  %682 = vmatpush.bf16.msrb.mxu0 %v1078_v34 }
  0x2c   :  { %605 = vmatpush.bf16.msra.mxu3 %v1086_v5 }
  0x2f   :  { %347 = vmatpush.bf16.msra.mxu2 %v1072_v8  ;;  %683 = vmatpush.bf16.msrb.mxu0 %v1077_v42 }
  0x30   :  { %606 = vmatpush.bf16.msra.mxu3 %v1085_v14 }
  0x32   :  { %879 = vmatmul.msk.bf16.gmra.mxu0 %vm199_vm5, %v171_v16 }
  0x33   :  { %348 = vmatpush.bf16.msra.mxu2 %v1071_v10  ;;  %684 = vmatpush.bf16.msrb.mxu0 %v1076_v46  ;;  %v1093_v10 = vld [vmem:[%s1378_s3 + $0x88] sm:$0xff]  ;;  %v461_v46 = vld [vmem:[#allocation3 + $0x8] sm:$0xe] }
  0x34   :  { %783 = vmatpush.bf16.msrb.mxu1 %v1093_v10 }
  0x36   :  { %899 = vmatmul.msk.bf16.vlgmr.msrb.gmra.mxu2 %vm199_vm5, %v234_v12 }
  0x38   :  { %784 = vmatpush.bf16.msrb.mxu1 %v1092_v18 }
  0x46   :  { %924 = vmatmul.msk.bf16.vlgmr.msra.gmra.mxu2 %vm199_vm5, %v305_v20 }
  0x56   :  { %925 = vmatmul.msk.bf16.gmra.mxu2 %vm199_vm5, %v307_v22 }
  0x66   :  { %926 = vmatmul.msk.bf16.gmra.mxu2 %vm199_vm5, %v306_v21  ;;  %v1084_v21 = vld [vmem:[%s1378_s3 + $0x40] sm:$0xff]  ;;  %vm466_vm5 = vmand %vm465_vm12, %vm67_vm1 }
  0x67   :  { %607 = vmatpush.bf16.msra.mxu3 %v1084_v21  ;;  %vm470_vm1 = vmand %vm426_vm6, %vm100_vm7  ;;  %vm829_vm7 = vcmask 1042432  }
  0x95   :  { %v275_v36 = vpop.f32.mrf.mxu1 }
  0x9d   :  { %v277_v51 = vpop.f32.mrf.mxu1 }
  0x9f   :  { %v218_v37 = vpop.f32.mrf.mxu0 }
  0xa0   :  { %v276_v48 = vadd.f32 %v275_v36, %v218_v37 }
  0xa5   :  { %v280_v4 = vpop.f32.mrf.mxu1 }
  0xa7   :  { %v220_v53 = vpop.f32.mrf.mxu0 }
  0xa8   :  { %v278_v62 = vadd.f32 %v277_v51, %v220_v53 }
  0xa9   :  { %v1249_v24 = vpop.f32.mrf.mxu2 }
  0xaf   :  { %v223_v3 = vpop.f32.mrf.mxu0 }
  0xb0   :  { %v281_v13 = vadd.f32 %v280_v4, %v223_v3 }
  0xb1   :  { %v230_v29 = vpop.f32.mrf.mxu2 }
  0xb2   :  { %v282_v29 = vpop.f32.mrf.mxu1 }
  0xb7   :  { %v225_v28 = vpop.f32.mrf.mxu0 }
  0xb8   :  { %v283_v38 = vadd.f32 %v282_v29, %v225_v28 }
  0xb9   :  { %v1268_v32 = vpop.f32.mrf.mxu2 }
  0xba   :  { %v286_v26 = vadd.f32 %v1268_v32, %v1249_v24 }
  0xc1   :  { %v287_v41 = vpop.f32.mrf.mxu2 }
  0xc9   :  { %v350_v52 = vpop.f32.mrf.mxu2 }
  0xca   :  { %v364_v55 = vadd.f32 %v350_v52, %v276_v48 }
  0xcc   :  { %v373_v57 = vadd.f32 %v1305_v50, %v364_v55 }
  0xce   :  { %v378_v59 = vmax.f32 %v373_v57, 0.0 }
  0xd0   :  { %v383_v61 = vpack.c.bf16 %v378_v59, %v378_v59 }
  0xd1   :  { %v352_v63 = vpop.f32.mrf.mxu2 }
  0xd2   :  { %v394_v1 = vshrl.u32 %v383_v61, 16  ;;  %v365_v2 = vadd.f32 %v352_v63, %v278_v62  ;;  %v397_v7 = vshll.u32 %v383_v61, 16 }
  0xd4   :  { %v396_v6 = vrot.slane %v394_v1, 7  ;;  %v374_v8 = vadd.f32 %v1305_v50, %v365_v2 }
  0xd6   :  { %v399_v11 = vor.u32 %v397_v7, %v396_v6  ;;  %v379_v12 = vmax.f32 %v374_v8, 0.0  ;;  %v400_v30 = vrot.slane %v396_v6, 4 }
  0xd8   :  { %v416_v15 = vsel %vm414_vm0, %v399_v11, %v415_v9  ;;  %v384_v16 = vpack.c.bf16 %v379_v12, %v379_v12 }
  0xd9   :  { %417 = vst [vmem:[#allocation3] sm:$0xf] %v416_v15  ;;  %v355_v17 = vpop.f32.mrf.mxu2 }
  0xda   :  { %v402_v19 = vshrl.u32 %v384_v16, 16  ;;  %v366_v20 = vadd.f32 %v355_v17, %v281_v13  ;;  %v405_v23 = vshll.u32 %v384_v16, 16 }
  0xdc   :  { %v404_v22 = vrot.slane %v402_v19, 7  ;;  %v375_v25 = vadd.f32 %v1305_v50, %v366_v20 }
  0xde   :  { %v407_v31 = vor.u32 %v405_v23, %v404_v22  ;;  %v409_v33 = vrot.slane %v404_v22, 4  ;;  %v380_v34 = vmax.f32 %v375_v25, 0.0 }
  0xe0   :  { %v408_v35 = vsel %vm1206_vm13, %v400_v30, %v407_v31  ;;  %v420_v36 = vsel %vm1256_vm11, %v409_v33, %v419_v27  ;;  %v385_v37 = vpack.c.bf16 %v380_v34, %v380_v34  ;;  %v1117_v6 = vld [vmem:[#allocation3] sm:$0xe] }
  0xe1   :  { %418 = vst [vmem:[#allocation3 + $0x4] sm:$0xf] %v408_v35  ;;  %v357_v39 = vpop.f32.mrf.mxu2 }
  0xe2   :  { %421 = vst [vmem:[#allocation3 + $0x8] sm:$0x1] %v420_v36  ;;  %v432_v40 = vshrl.u32 %v385_v37, 16  ;;  %v367_v41 = vadd.f32 %v357_v39, %v283_v38  ;;  %v435_v44 = vshll.u32 %v385_v37, 16 }
  0xe4   :  { %v434_v42 = vrot.slane %v432_v40, 7  ;;  %v376_v45 = vadd.f32 %v1305_v50, %v367_v41 }
  0xe6   :  { %v437_v47 = vor.u32 %v435_v44, %v434_v42  ;;  %v381_v48 = vmax.f32 %v376_v45, 0.0  ;;  %v438_v61 = vrot.slane %v434_v42, 4 }
  0xe8   :  { %v462_v49 = vsel %vm460_vm3, %v437_v47, %v461_v46  ;;  %v386_v51 = vpack.c.bf16 %v381_v48, %v381_v48  ;;  %v1105_v52 = vld [vmem:[#allocation3] sm:$0xff]  }
  0xe9   :  { %v423_v53 = vld [vmem:[#allocation3 + $0x8] sm:$0x1]  ;;  %463 = vst [vmem:[#allocation3 + $0x8] sm:$0xe] %v462_v49  ;;  %v360_v54 = vpop.f32.mrf.mxu2  ;;  %685 = vmatmul.bf16.vlgmr.msrb.gmra.mxu0 %v1105_v52  ;;  %v1116_v2 = vld [vmem:[#allocation3] sm:$0xf0] }
  0xea   :  { %v424_v55 = vsel %vm422_vm4, 0, %v423_v53  ;;  %v440_v56 = vshrl.u32 %v386_v51, 16  ;;  %v368_v57 = vadd.f32 %v360_v54, %v286_v26  ;;  %v443_v59 = vshll.u32 %v386_v51, 16 }
  0xeb   :  { %425 = vst [vmem:[#allocation3 + $0x8] sm:$0x1] %v424_v55  ;;  %v529_v5 = vshll.u32 %v1105_v52, 16  ;;  %v1118_v9 = vor.u32 %v1117_v6, %v1116_v2  ;;  %v527_v14 = vshrl.u32 %v1105_v52, 16  ;;  %v1128_v52 = vld [vmem:[%s1379_s4] ss:$0 sm:$0xff] }
  0xec   :  { %v442_v58 = vrot.slane %v440_v56, 7  ;;  %v377_v60 = vadd.f32 %v1305_v50, %v368_v57  ;;  %v467_v50 = vld [vmem:[#allocation3 + $0x10] sm:$0x3] }
  0xed   :  { %v531_v11 = vrot.slane %v529_v5, 1  ;;  %v721_v15 = vrot.slane %v1118_v9, 1 }
  0xee   :  { %v445_v62 = vor.u32 %v443_v59, %v442_v58  ;;  %v382_v63 = vmax.f32 %v377_v60, 0.0  ;;  %v447_v7 = vrot.slane %v442_v58, 4 }
  0xef   :  { %v532_v19 = vor.u32 %v531_v11, %v527_v14 }
  0xf0   :  { %v446_v24 = vsel %vm1206_vm13, %v438_v61, %v445_v62  ;;  %v387_v32 = vpack.c.bf16 %v382_v63, %v382_v63 }
  0xf1   :  { %464 = vst [vmem:[#allocation3 + $0xc] sm:$0xf] %v446_v24  ;;  %v362_v0 = vpop.f32.mrf.mxu2 }
  0xf2   :  { %v449_v1 = vshrl.u32 %v387_v32, 16  ;;  %v452_v4 = vshll.u32 %v387_v32, 16 }
  0xf4   :  { %v451_v3 = vrot.slane %v449_v1, 7 }
  0xf6   :  { %v454_v8 = vor.u32 %v452_v4, %v451_v3 }
  0xf8   :  { %v455_v10 = vsel %vm1206_vm13, %v447_v7, %v454_v8  ;;  %v1075_v12 = vld [vmem:[#allocation3 + $0x8] sm:$0xff]  ;;  %vm830_vm13 = vcmask 1046532  }
  0xf9   :  { %v468_v13 = vsel %vm466_vm5, %v455_v10, %v467_v50  ;;  %690 = vmatmul.bf16.gmra.mxu0 %v1075_v12  ;;  %v722_v16 = vrot.slane %v1075_v12, 1  ;;  %v534_v17 = vshll.u32 %v1075_v12, 16  ;;  %v538_v33 = vshrl.u32 %v1075_v12, 16 }
  0xfa   :  { %469 = vst [vmem:[#allocation3 + $0x10] sm:$0x3] %v468_v13 }
  0xfb   :  { %v723_v18 = vsel %vm302_vm9, %v721_v15, %v722_v16  ;;  %v536_v20 = vrot.slane %v534_v17, 1 }
  0xfc   :  { %785 = vmatmul.bf16.vlgmr.msrb.gmra.mxu1 %v723_v18 }
  0xfd   :  { %v537_v21 = vsel %vm151_vm8, %v532_v19, %v536_v20  ;;  %v540_v36 = vor.u32 %v538_v33, %v536_v20 }
  0xfe   :  { %608 = vmatmul.bf16.vlgmr.msra.gmra.mxu3 %v537_v21 }
 0x101   :  { %v471_v43 = vld [vmem:[#allocation3 + $0x10] sm:$0x2]  ;;  %v478_v22 = vld [vmem:[#allocation3 + $0x10] sm:$0x1] }
 0x102   :  { %v472_v23 = vsel %vm470_vm1, 0, %v471_v43  ;;  %v624_v25 = vunpack.c.l.b16 %v478_v22 }
 0x103   :  { %473 = vst [vmem:[#allocation3 + $0x10] sm:$0x2] %v472_v23 }
 0x104   :  { %v625_v27 = vpack.c.b16 %v624_v25, %v624_v25 }
 0x109   :  { %695 = vmatmul.bf16.gmra.mxu0 %v625_v27 }
 0x10a   :  { %v495_v28 = vld [vmem:[#allocation3 + $0x10] sm:$0x3] }
 0x10b   :  { %v522_v29 = vunpack.c.l.b16 %v495_v28 }
 0x10d   :  { %v525_v30 = vpack.c.b16 %v522_v29, %v522_v29 }
 0x10f   :  { %v724_v31 = vrot.slane %v525_v30, 1  ;;  %v542_v34 = vshll.u32 %v525_v30, 16  ;;  %v546_v39 = vshrl.u32 %v525_v30, 16 }
 0x111   :  { %v725_v35 = vsel %vm302_vm9, %v722_v16, %v724_v31  ;;  %v544_v37 = vrot.slane %v542_v34, 1 }
 0x112   :  { %790 = vmatmul.bf16.gmra.mxu1 %v725_v35 }
 0x113   :  { %v545_v38 = vsel %vm151_vm8, %v540_v36, %v544_v37  ;;  %v548_v40 = vor.u32 %v546_v39, %v544_v37  ;;  %vm831_vm8 = vmor %vm829_vm7, %vm830_vm13 }
 0x114   :  { %613 = vmatmul.bf16.gmra.mxu3 %v545_v38 }
 0x122   :  { %795 = vmatmul.bf16.gmra.mxu1 %v724_v31 }
 0x124   :  { %618 = vmatmul.bf16.gmra.mxu3 %v548_v40 }
 0x166   :  { %v686_v41 = vpop.f32.mrf.mxu0 }
 0x16e   :  { %v688_v42 = vpop.f32.mrf.mxu0 }
 0x176   :  { %v691_v44 = vpop.f32.mrf.mxu0 }
 0x179   :  { %v786_v45 = vpop.f32.mrf.mxu1 }
 0x17e   :  { %v693_v46 = vpop.f32.mrf.mxu0 }
 0x181   :  { %v609_v47 = vpop.f32.mrf.mxu3  ;;  %v788_v26 = vpop.f32.mrf.mxu1 }
 0x182   :  { %v687_v48 = vadd.f32 %v686_v41, %v609_v47 }
 0x184   :  { %v800_v51 = vadd.f32 %v786_v45, %v687_v48 }
 0x186   :  { %v696_v49 = vpop.f32.mrf.mxu0  ;;  %v809_v55 = vadd.f32 %v1128_v52, %v800_v51 }
 0x188   :  { %v814_v60 = vmax.f32 %v809_v55, 0.0 }
 0x189   :  { %v611_v53 = vpop.f32.mrf.mxu3 }
 0x18a   :  { %v689_v54 = vadd.f32 %v688_v42, %v611_v53 }
 0x18c   :  { %v801_v56 = vadd.f32 %v788_v26, %v689_v54 }
 0x18e   :  { %v810_v57 = vadd.f32 %v1128_v52, %v801_v56  ;;  %v698_v59 = vpop.f32.mrf.mxu0 }
 0x18f   :  { %v791_v58 = vpop.f32.mrf.mxu1 }
 0x190   :  { %v815_v61 = vmax.f32 %v810_v57, 0.0 }
 0x192   :  { %v1111_v62 = vpack.c.bf16 %v815_v61, %v814_v60 }
 0x194   :  { %1112 = vst [vmem:[%s1380_s5] sm:$0xff] %v1111_v62  }
 0x197   :  { %v614_v63 = vpop.f32.mrf.mxu3  ;;  %v793_v24 = vpop.f32.mrf.mxu1 }
 0x198   :  { %v692_v32 = vadd.f32 %v691_v44, %v614_v63 }
 0x19a   :  { %v802_v0 = vadd.f32 %v791_v58, %v692_v32 }
 0x19c   :  { %v811_v1 = vadd.f32 %v1128_v52, %v802_v0 }
 0x19e   :  { %v816_v5 = vmax.f32 %v811_v1, 0.0 }
 0x19f   :  { %v616_v2 = vpop.f32.mrf.mxu3  ;;  %v796_v3 = vpop.f32.mrf.mxu1 }
 0x1a0   :  { %v694_v4 = vadd.f32 %v693_v46, %v616_v2  ;;  %v823_v8 = vpack.c.bf16 %v816_v5, %v816_v5 }
 0x1a2   :  { %v803_v6 = vadd.f32 %v793_v24, %v694_v4  ;;  %v1059_v13 = vrot.slane %v823_v8, 9 }
 0x1a4   :  { %v812_v7 = vadd.f32 %v1128_v52, %v803_v6 }
 0x1a6   :  { %v817_v50 = vmax.f32 %v812_v7, 0.0 }
 0x1a7   :  { %v619_v9 = vpop.f32.mrf.mxu3  ;;  %v798_v10 = vpop.f32.mrf.mxu1 }
 0x1a8   :  { %v824_v11 = vpack.c.bf16 %v817_v50, %v817_v50  ;;  %v697_v12 = vadd.f32 %v696_v49, %v619_v9 }
 0x1aa   :  { %v834_v14 = vrot.slane %v824_v11, 5  ;;  %v804_v15 = vadd.f32 %v796_v3, %v697_v12 }
 0x1ac   :  { %v835_v16 = vsel %vm831_vm8, %v1059_v13, %v834_v14  ;;  %v813_v17 = vadd.f32 %v1128_v52, %v804_v15  ;;  %v836_v21 = vrot.slane %v834_v14, 4 }
 0x1ad   :  { %1060 = vst [vmem:[%s1380_s5 + $0x8] sm:$0xf] %v835_v16 }
 0x1ae   :  { %v818_v18 = vmax.f32 %v813_v17, 0.0 }
 0x1af   :  { %v621_v19 = vpop.f32.mrf.mxu3 }
 0x1b0   :  { %v825_v20 = vpack.c.bf16 %v818_v18, %v818_v18 }
 0x1b2   :  { %v837_v43 = vrot.slane %v825_v20, 5 }
 0x1b4   :  { %v838_v22 = vsel %vm831_vm8, %v836_v21, %v837_v43 }
 0x1b5   :  { %1061 = vst [vmem:[%s1380_s5 + $0xc] sm:$0xf] %v838_v22 }

</bundles_post_ra>
